<compile_context>
chip_gen: v5e
topology: v5e:2x2
jax: 0.10.0
libtpu: 0.0.40
codegen_flags: <defaults>
</compile_context>

<pallas_src>
import math

import jax
import jax.numpy as jnp
from jax import lax
from jax.experimental import pallas as pl
from jax.experimental.pallas import tpu as pltpu

# --- hyperparameters implied by get_config() ---------------------------------
PLANE_DIM = 32                 # embed_dim E (also S, the number of keys)
NUM_HEADS = 4
HEAD_DIM = PLANE_DIM // NUM_HEADS      # 8
MHA_FF_DIM = PLANE_DIM * 2             # 64  (feed-forward inside MHA block)
HEAD_FF_DIM = PLANE_DIM * 2            # 64  (hidden dim of ActionHead.FF)
OUT_DIM = 3
LANE = 128                             # lane-dense width: NUM_HEADS * S == padded classes
LN_EPS = 1e-5
LEAKY_SLOPE = 0.2
NEG = -1e30                            # logit value for padded (fake) classes
MAX_ROW_TILE = 512                     # rows per grid step


def _leaky_relu(x):
    return jnp.where(x >= 0, x, LEAKY_SLOPE * x)


def _layer_norm(x, gamma, beta):
    mean = jnp.mean(x, axis=-1, keepdims=True)
    var = jnp.mean((x - mean) ** 2, axis=-1, keepdims=True)
    return (x - mean) * lax.rsqrt(var + LN_EPS) * gamma + beta


def _round_up(x, m):
    return (x + m - 1) // m * m


# --- the Pallas kernel: ActionHead forward for one row tile --------------------
def action_head_kernel(
    p_ref, mask_ref,
    wscore_ref, vout_ref, bsum_ref,
    mw1T_ref, mw2T_ref, hw1T_ref, hw2T_ref,
    vec_ref,
    out_ref,
):
    f32 = jnp.float32
    q = p_ref[...]                                                  # (R, E)

    # ---- fused 4-head attention: one lane-dense score matmul -----------------
    # wscore = scale * WqT @ [ (K*mask_h).T | h ]   -> q @ wscore == all head scores
    s = jnp.dot(q, wscore_ref[...], preferred_element_type=f32)    # (R, 128)
    # one shared row max is valid: the max cancels inside each head's softmax
    m = jnp.max(s, axis=-1, keepdims=True)
    e = jnp.exp(s - m)
    # per-head denominators, broadcast back across lanes via block-sum matmul
    den = jnp.dot(e, bsum_ref[...], preferred_element_type=f32)    # (R, 128)
    attn = e * pl.reciprocal(den, approx=True)
    # vout = stack_h(V * mask_h) @ WoT  (disjoint head masks == head concat)
    ao = jnp.dot(attn, vout_ref[...], preferred_element_type=f32)  # (R, E)

    # ---- packed LayerNorm / bias parameters (single (8,128) tensor) ----------
    ln1_g = vec_ref[0:1, :PLANE_DIM]
    ln1_b = vec_ref[1:2, :PLANE_DIM]
    mb1 = vec_ref[2:3, :MHA_FF_DIM]
    mb2 = vec_ref[3:4, :PLANE_DIM]
    hb1 = vec_ref[4:5, :HEAD_FF_DIM]    # LN2 beta already folded in
    hb2 = vec_ref[5:6, :]               # (1, LANE), padded classes hold NEG

    # ---- residual + LayerNorm1 ------------------------------------------------
    x = _layer_norm(ao + q, ln1_g, ln1_b)

    # ---- MHA FF (32->64, LeakyReLU, 64->32) + residual ------------------------
    h1 = _leaky_relu(jnp.dot(x, mw1T_ref[...], preferred_element_type=f32) + mb1)
    h2 = jnp.dot(h1, mw2T_ref[...], preferred_element_type=f32) + mb2
    z = x + h2

    # ---- LayerNorm2 (affine folded into hw1/hb1 at trace time) ----------------
    mu = jnp.mean(z, axis=-1, keepdims=True)
    var = jnp.mean((z - mu) ** 2, axis=-1, keepdims=True)
    n = (z - mu) * lax.rsqrt(var + LN_EPS)

    # ---- ActionHead.FF (32->64, LeakyReLU, 64->3 padded to 128) ---------------
    y = _leaky_relu(jnp.dot(n, hw1T_ref[...], preferred_element_type=f32) + hb1)
    y = jnp.dot(y, hw2T_ref[...], preferred_element_type=f32) + hb2   # (R, LANE)
    y = y + mask_ref[...]                                             # additive mask (0 on pads)

    # ---- log_softmax over the lane-dense last dim (padded cols are -1e30) ----
    y = y - jnp.max(y, axis=-1, keepdims=True)
    out_ref[...] = y - jnp.log(jnp.sum(jnp.exp(y), axis=-1, keepdims=True))


# --- wrapper ------------------------------------------------------------------
def action_head(p, a, params, mask=None):
    f32 = jnp.float32
    P = p.shape[0]
    kv = a.reshape(PLANE_DIM, PLANE_DIM).astype(f32)       # a.view(plane_dim, plane_dim)
    if mask is None:
        mask = jnp.zeros((P, OUT_DIM), f32)

    # --- row padding / tiling (grid over row tiles) ---
    row_tile = min(MAX_ROW_TILE, _round_up(P, 8))
    total = _round_up(P, row_tile)
    p_pad = jnp.zeros((total, PLANE_DIM), f32).at[:P, :].set(p.astype(f32))
    mask_pad = jnp.zeros((total, LANE), f32).at[:P, :OUT_DIM].set(mask.astype(f32))

    # --- pre-transpose weights at trace time (removes all in-kernel .T) ---
    t = lambda w: jnp.asarray(w, f32).T
    wqT, wkT, wvT, woT = t(params["wq"]), t(params["wk"]), t(params["wv"]), t(params["wo"])
    mw1T, mw2T = t(params["mw1"]), t(params["mw2"])

    # LN2 affine folded into the head-FF first layer (LN2 output only feeds it)
    g2 = params["ln2_g"].astype(f32)
    b2 = params["ln2_b"].astype(f32)
    hw1T = t(params["hw1"])                                  # (32, 64)
    hw1T_f = g2[:, None] * hw1T
    hb1_f = b2 @ hw1T + params["hb1"].astype(f32)            # (64,)

    # lane-dense final projection: fake classes get zero weight + NEG bias
    hw2T = jnp.zeros((HEAD_FF_DIM, LANE), f32).at[:, :OUT_DIM].set(t(params["hw2"]))

    # --- attention constants (depend only on a + weights): computed once here,
    #     not per row tile inside the kernel.
    heads = jnp.arange(PLANE_DIM) // HEAD_DIM                # feature -> head id
    K = kv @ wkT                                             # (S, E)
    V = kv @ wvT                                             # (S, E)
    scale = 1.0 / math.sqrt(HEAD_DIM)
    #   q @ Wscore == concat_h [ Q_h @ K_h^T ] * scale,  shape (E, H*S) = (32, 128)
    Msc = jnp.concatenate([(K * (heads == h)).T for h in range(NUM_HEADS)], axis=1)
    Wscore = scale * (wqT @ Msc)
    #   attn @ VstackO == concat_heads(attn_h @ V_h) @ Wo^T, shape (H*S, E)
    Vstack = jnp.concatenate([V * (heads == h) for h in range(NUM_HEADS)], axis=0)
    VstackO = Vstack @ woT                                   # (128, 32)
    #   block-sum matrix: lane i, j same head-block -> 1   (per-head softmax denom)
    blk = jnp.arange(LANE) // PLANE_DIM
    Bsum = (blk[:, None] == blk[None, :]).astype(f32)        # (128, 128)

    # --- pack all small vectors into one (8, LANE) tensor (single DMA) ---
    vec = jnp.zeros((8, LANE), f32)
    vec = vec.at[0, :PLANE_DIM].set(params["ln1_g"].astype(f32))
    vec = vec.at[1, :PLANE_DIM].set(params["ln1_b"].astype(f32))
    vec = vec.at[2, :MHA_FF_DIM].set(params["mb1"].astype(f32))
    vec = vec.at[3, :PLANE_DIM].set(params["mb2"].astype(f32))
    vec = vec.at[4, :HEAD_FF_DIM].set(hb1_f)
    vec = vec.at[5, :].set(
        jnp.full((LANE,), NEG, f32).at[:OUT_DIM].set(params["hb2"].astype(f32)))

    grid = (total // row_tile,)
    row32 = pl.BlockSpec((row_tile, PLANE_DIM), lambda i: (i, 0))
    row128 = pl.BlockSpec((row_tile, LANE), lambda i: (i, 0))
    const = lambda shape: pl.BlockSpec(shape, lambda i: (0, 0))   # stays VMEM-resident

    out = pl.pallas_call(
        action_head_kernel,
        out_shape=jax.ShapeDtypeStruct((total, LANE), f32),
        grid=grid,
        in_specs=[
            row32, row128,
            const((PLANE_DIM, LANE)),        # Wscore
            const((LANE, PLANE_DIM)),        # VstackO
            const((LANE, LANE)),             # Bsum
            const((PLANE_DIM, MHA_FF_DIM)),  # mw1T
            const((MHA_FF_DIM, PLANE_DIM)),  # mw2T
            const((PLANE_DIM, HEAD_FF_DIM)), # hw1T (LN2-folded)
            const((HEAD_FF_DIM, LANE)),      # hw2T (lane-padded)
            const((8, LANE)),                # packed vectors
        ],
        out_specs=row128,
        compiler_params=pltpu.CompilerParams(
            dimension_semantics=("parallel",)),   # shards row tiles over v7x's 2 TCs
    )(p_pad, mask_pad, Wscore, VstackO, Bsum, mw1T, mw2T, hw1T_f, hw2T, vec)

    return out[:P, :OUT_DIM]


# --- pure-JAX reference (numerical sanity check, mirrors the PyTorch module) ---
def action_head_ref(p, a, params, mask):
    q = p.astype(jnp.float32)
    kv = a.reshape(PLANE_DIM, PLANE_DIM).astype(jnp.float32)
    Q = q @ params["wq"].T
    K = kv @ params["wk"].T
    V = kv @ params["wv"].T
    scale = 1.0 / math.sqrt(HEAD_DIM)
    outs = []
    for h in range(NUM_HEADS):
        sl = slice(h * HEAD_DIM, (h + 1) * HEAD_DIM)
        s = (Q[:, sl] @ K[:, sl].T) * scale
        outs.append(jax.nn.softmax(s, axis=-1) @ V[:, sl])
    o = jnp.concatenate(outs, axis=-1) @ params["wo"].T
    x = _layer_norm(o + q, params["ln1_g"], params["ln1_b"])
    ff = _leaky_relu(x @ params["mw1"].T + params["mb1"]) @ params["mw2"].T + params["mb2"]
    x = _layer_norm(x + ff, params["ln2_g"], params["ln2_b"])
    y = _leaky_relu(x @ params["hw1"].T + params["hb1"]) @ params["hw2"].T + params["hb2"]
    y = y + mask
    return jax.nn.log_softmax(y, axis=-1)


# --- deterministic parameter init (shapes from the nn.Module __init__) ---------
def init_params(key):
    keys = jax.random.split(key, 12)
    w = lambda k, shape: (0.1 * jax.random.normal(k, shape)).astype(jnp.float32)
    E, F, H = PLANE_DIM, MHA_FF_DIM, HEAD_FF_DIM
    return dict(
        # in_proj_weight (3E, E) split into q/k/v ; out_proj (E, E); bias=False everywhere
        wq=w(keys[0], (E, E)), wk=w(keys[1], (E, E)), wv=w(keys[2], (E, E)),
        wo=w(keys[3], (E, E)),
        ln1_g=jnp.ones((E,), jnp.float32), ln1_b=jnp.zeros((E,), jnp.float32),
        mw1=w(keys[4], (F, E)), mb1=w(keys[5], (F,)),
        mw2=w(keys[6], (E, F)), mb2=w(keys[7], (E,)),
        ln2_g=jnp.ones((E,), jnp.float32), ln2_b=jnp.zeros((E,), jnp.float32),
        hw1=w(keys[8], (H, E)), hb1=w(keys[9], (H,)),
        hw2=w(keys[10], (OUT_DIM, H)), hb2=w(keys[11], (OUT_DIM,)),
    )


if __name__ == "__main__":
    key = jax.random.PRNGKey(0)
    kp, ka, km, kw, kp2, km2 = jax.random.split(key, 6)
    params = init_params(kw)

    # small case (grid = 1 tile)
    P = 8
    p = jax.random.normal(kp, (P, PLANE_DIM), jnp.float32)
    a = jax.random.normal(ka, (PLANE_DIM * PLANE_DIM,), jnp.float32)  # flattened aggregation
    mask = 0.5 * jax.random.normal(km, (P, OUT_DIM), jnp.float32)

    out = jax.block_until_ready(action_head(p, a, params, mask))
    ref = jax.block_until_ready(action_head_ref(p, a, params, mask))
    assert out.shape == (P, OUT_DIM)
    assert bool(jnp.all(jnp.isfinite(out)))
    assert float(jnp.max(jnp.abs(out - ref))) < 1e-2, "kernel mismatch vs JAX reference (P=8)"

    # batched case exercising the row grid (3 tiles of 512 rows, with padding)
    P2 = 1200
    p2 = jax.random.normal(kp2, (P2, PLANE_DIM), jnp.float32)
    mask2 = 0.5 * jax.random.normal(km2, (P2, OUT_DIM), jnp.float32)
    out2 = jax.block_until_ready(action_head(p2, a, params, mask2))
    ref2 = jax.block_until_ready(action_head_ref(p2, a, params, mask2))
    assert out2.shape == (P2, OUT_DIM)
    assert bool(jnp.all(jnp.isfinite(out2)))
    assert float(jnp.max(jnp.abs(out2 - ref2))) < 1e-2, "kernel mismatch vs JAX reference (P=1200)"

    # mask=None path (matches the module's optional mask)
    out3 = jax.block_until_ready(action_head(p, a, params, None))
    ref3 = action_head_ref(p, a, params, jnp.zeros((P, OUT_DIM), jnp.float32))
    assert float(jnp.max(jnp.abs(out3 - ref3))) < 1e-2

    print("KERNEL_OK")
</pallas_src>

<mosaic_0001>
module attributes {stable_mosaic.version = 11 : i64} {
  func.func @action_head_kernel(%arg0: i32, %arg1: memref<8x32xf32, #tpu.memory_space<vmem>>, %arg2: memref<8x128xf32, #tpu.memory_space<vmem>>, %arg3: memref<32x128xf32, #tpu.memory_space<vmem>>, %arg4: memref<128x32xf32, #tpu.memory_space<vmem>>, %arg5: memref<128x128xf32, #tpu.memory_space<vmem>>, %arg6: memref<32x64xf32, #tpu.memory_space<vmem>>, %arg7: memref<64x32xf32, #tpu.memory_space<vmem>>, %arg8: memref<32x64xf32, #tpu.memory_space<vmem>>, %arg9: memref<64x128xf32, #tpu.memory_space<vmem>>, %arg10: memref<8x128xf32, #tpu.memory_space<vmem>>, %arg11: memref<8x128xf32, #tpu.memory_space<vmem>>) attributes {dimension_semantics = [#tpu.dimension_semantics<parallel>], iteration_bounds = array<i64: 1>, scalar_prefetch = 0 : i64, scratch_operands = 0 : i64, tpu.core_type = #tpu.core_type<tc>, window_params = [{transform_indices = @transform_0, window_bounds = array<i64: 8, 32>}, {transform_indices = @transform_1, window_bounds = array<i64: 8, 128>}, {pipeline_mode = #tpu.pipeline_mode<synchronous>, transform_indices = @transform_2, window_bounds = array<i64: 32, 128>}, {pipeline_mode = #tpu.pipeline_mode<synchronous>, transform_indices = @transform_3, window_bounds = array<i64: 128, 32>}, {pipeline_mode = #tpu.pipeline_mode<synchronous>, transform_indices = @transform_4, window_bounds = array<i64: 128, 128>}, {pipeline_mode = #tpu.pipeline_mode<synchronous>, transform_indices = @transform_5, window_bounds = array<i64: 32, 64>}, {pipeline_mode = #tpu.pipeline_mode<synchronous>, transform_indices = @transform_6, window_bounds = array<i64: 64, 32>}, {pipeline_mode = #tpu.pipeline_mode<synchronous>, transform_indices = @transform_7, window_bounds = array<i64: 32, 64>}, {pipeline_mode = #tpu.pipeline_mode<synchronous>, transform_indices = @transform_8, window_bounds = array<i64: 64, 128>}, {pipeline_mode = #tpu.pipeline_mode<synchronous>, transform_indices = @transform_9, window_bounds = array<i64: 8, 128>}, {transform_indices = @transform_10, window_bounds = array<i64: 8, 128>}]} {
    %c0 = arith.constant 0 : index
    %c0_0 = arith.constant 0 : index
    %0 = vector.load %arg1[%c0, %c0_0] : memref<8x32xf32, #tpu.memory_space<vmem>>, vector<8x32xf32>
    %c0_1 = arith.constant 0 : index
    %c0_2 = arith.constant 0 : index
    %1 = vector.load %arg3[%c0_1, %c0_2] : memref<32x128xf32, #tpu.memory_space<vmem>>, vector<32x128xf32>
    %cst = arith.constant dense<0.000000e+00> : vector<8x128xf32>
    %2 = tpu.matmul %0, %1, %cst {dimension_numbers = #tpu.dot_dimension_numbers<[1], [0], [0], [1], [0, 0, 1, 1], [], []>} : vector<8x32xf32>, vector<32x128xf32>, vector<8x128xf32> -> vector<8x128xf32>
    %cst_3 = arith.constant dense<0xFF800000> : vector<8xf32>
    %3 = vector.multi_reduction <maximumf>, %2, %cst_3 [1] : vector<8x128xf32> to vector<8xf32>
    %4 = vector.shape_cast %3 : vector<8xf32> to vector<8x1xf32>
    %5 = vector.broadcast %4 : vector<8x1xf32> to vector<8x128xf32>
    %6 = arith.subf %2, %5 : vector<8x128xf32>
    %7 = math.exp %6 : vector<8x128xf32>
    %c0_4 = arith.constant 0 : index
    %c0_5 = arith.constant 0 : index
    %8 = vector.load %arg5[%c0_4, %c0_5] : memref<128x128xf32, #tpu.memory_space<vmem>>, vector<128x128xf32>
    %cst_6 = arith.constant dense<0.000000e+00> : vector<8x128xf32>
    %9 = tpu.matmul %7, %8, %cst_6 {dimension_numbers = #tpu.dot_dimension_numbers<[1], [0], [0], [1], [0, 0, 1, 1], [], []>} : vector<8x128xf32>, vector<128x128xf32>, vector<8x128xf32> -> vector<8x128xf32>
    %10 = tpu.reciprocal %9 {approx = true} : vector<8x128xf32> -> vector<8x128xf32>
    %11 = arith.mulf %7, %10 : vector<8x128xf32>
    %c0_7 = arith.constant 0 : index
    %c0_8 = arith.constant 0 : index
    %12 = vector.load %arg4[%c0_7, %c0_8] : memref<128x32xf32, #tpu.memory_space<vmem>>, vector<128x32xf32>
    %cst_9 = arith.constant dense<0.000000e+00> : vector<8x32xf32>
    %13 = tpu.matmul %11, %12, %cst_9 {dimension_numbers = #tpu.dot_dimension_numbers<[1], [0], [0], [1], [0, 0, 1, 1], [], []>} : vector<8x128xf32>, vector<128x32xf32>, vector<8x32xf32> -> vector<8x32xf32>
    %c0_10 = arith.constant 0 : index
    %c0_11 = arith.constant 0 : index
    %14 = vector.load %arg10[%c0_10, %c0_11] : memref<8x128xf32, #tpu.memory_space<vmem>>, vector<1x32xf32>
    %c1 = arith.constant 1 : index
    %c0_12 = arith.constant 0 : index
    %15 = vector.load %arg10[%c1, %c0_12] : memref<8x128xf32, #tpu.memory_space<vmem>>, vector<1x32xf32>
    %c2 = arith.constant 2 : index
    %c0_13 = arith.constant 0 : index
    %16 = vector.load %arg10[%c2, %c0_13] : memref<8x128xf32, #tpu.memory_space<vmem>>, vector<1x64xf32>
    %c3 = arith.constant 3 : index
    %c0_14 = arith.constant 0 : index
    %17 = vector.load %arg10[%c3, %c0_14] : memref<8x128xf32, #tpu.memory_space<vmem>>, vector<1x32xf32>
    %c4 = arith.constant 4 : index
    %c0_15 = arith.constant 0 : index
    %18 = vector.load %arg10[%c4, %c0_15] : memref<8x128xf32, #tpu.memory_space<vmem>>, vector<1x64xf32>
    %c5 = arith.constant 5 : index
    %c0_16 = arith.constant 0 : index
    %19 = vector.load %arg10[%c5, %c0_16] : memref<8x128xf32, #tpu.memory_space<vmem>>, vector<1x128xf32>
    %20 = arith.addf %13, %0 : vector<8x32xf32>
    %cst_17 = arith.constant dense<0.000000e+00> : vector<8xf32>
    %21 = vector.multi_reduction <add>, %20, %cst_17 [1] : vector<8x32xf32> to vector<8xf32>
    %22 = vector.shape_cast %21 : vector<8xf32> to vector<8x1xf32>
    %cst_18 = arith.constant 3.200000e+01 : f32
    %23 = vector.broadcast %cst_18 : f32 to vector<8x1xf32>
    %24 = arith.divf %22, %23 : vector<8x1xf32>
    %25 = vector.broadcast %24 : vector<8x1xf32> to vector<8x32xf32>
    %26 = arith.subf %20, %25 : vector<8x32xf32>
    %27 = arith.mulf %26, %26 : vector<8x32xf32>
    %cst_19 = arith.constant dense<0.000000e+00> : vector<8xf32>
    %28 = vector.multi_reduction <add>, %27, %cst_19 [1] : vector<8x32xf32> to vector<8xf32>
    %29 = vector.shape_cast %28 : vector<8xf32> to vector<8x1xf32>
    %cst_20 = arith.constant 3.200000e+01 : f32
    %30 = vector.broadcast %cst_20 : f32 to vector<8x1xf32>
    %31 = arith.divf %29, %30 : vector<8x1xf32>
    %32 = vector.broadcast %24 : vector<8x1xf32> to vector<8x32xf32>
    %33 = arith.subf %20, %32 : vector<8x32xf32>
    %cst_21 = arith.constant 9.99999974E-6 : f32
    %34 = vector.broadcast %cst_21 : f32 to vector<8x1xf32>
    %35 = arith.addf %31, %34 : vector<8x1xf32>
    %36 = math.rsqrt %35 : vector<8x1xf32>
    %37 = vector.broadcast %36 : vector<8x1xf32> to vector<8x32xf32>
    %38 = arith.mulf %33, %37 : vector<8x32xf32>
    %39 = vector.broadcast %14 : vector<1x32xf32> to vector<8x32xf32>
    %40 = arith.mulf %38, %39 : vector<8x32xf32>
    %41 = vector.broadcast %15 : vector<1x32xf32> to vector<8x32xf32>
    %42 = arith.addf %40, %41 : vector<8x32xf32>
    %c0_22 = arith.constant 0 : index
    %c0_23 = arith.constant 0 : index
    %43 = vector.load %arg6[%c0_22, %c0_23] : memref<32x64xf32, #tpu.memory_space<vmem>>, vector<32x64xf32>
    %cst_24 = arith.constant dense<0.000000e+00> : vector<8x64xf32>
    %44 = tpu.matmul %42, %43, %cst_24 {dimension_numbers = #tpu.dot_dimension_numbers<[1], [0], [0], [1], [0, 0, 1, 1], [], []>} : vector<8x32xf32>, vector<32x64xf32>, vector<8x64xf32> -> vector<8x64xf32>
    %45 = vector.broadcast %16 : vector<1x64xf32> to vector<8x64xf32>
    %46 = arith.addf %44, %45 : vector<8x64xf32>
    %cst_25 = arith.constant 0.000000e+00 : f32
    %47 = vector.broadcast %cst_25 : f32 to vector<8x64xf32>
    %48 = arith.cmpf oge, %46, %47 : vector<8x64xf32>
    %cst_26 = arith.constant 2.000000e-01 : f32
    %49 = vector.broadcast %cst_26 : f32 to vector<8x64xf32>
    %50 = arith.mulf %49, %46 : vector<8x64xf32>
    %51 = arith.select %48, %46, %50 : vector<8x64xi1>, vector<8x64xf32>
    %c0_27 = arith.constant 0 : index
    %c0_28 = arith.constant 0 : index
    %52 = vector.load %arg7[%c0_27, %c0_28] : memref<64x32xf32, #tpu.memory_space<vmem>>, vector<64x32xf32>
    %cst_29 = arith.constant dense<0.000000e+00> : vector<8x32xf32>
    %53 = tpu.matmul %51, %52, %cst_29 {dimension_numbers = #tpu.dot_dimension_numbers<[1], [0], [0], [1], [0, 0, 1, 1], [], []>} : vector<8x64xf32>, vector<64x32xf32>, vector<8x32xf32> -> vector<8x32xf32>
    %54 = vector.broadcast %17 : vector<1x32xf32> to vector<8x32xf32>
    %55 = arith.addf %53, %54 : vector<8x32xf32>
    %56 = arith.addf %42, %55 : vector<8x32xf32>
    %cst_30 = arith.constant dense<0.000000e+00> : vector<8xf32>
    %57 = vector.multi_reduction <add>, %56, %cst_30 [1] : vector<8x32xf32> to vector<8xf32>
    %58 = vector.shape_cast %57 : vector<8xf32> to vector<8x1xf32>
    %cst_31 = arith.constant 3.200000e+01 : f32
    %59 = vector.broadcast %cst_31 : f32 to vector<8x1xf32>
    %60 = arith.divf %58, %59 : vector<8x1xf32>
    %61 = vector.broadcast %60 : vector<8x1xf32> to vector<8x32xf32>
    %62 = arith.subf %56, %61 : vector<8x32xf32>
    %63 = arith.mulf %62, %62 : vector<8x32xf32>
    %cst_32 = arith.constant dense<0.000000e+00> : vector<8xf32>
    %64 = vector.multi_reduction <add>, %63, %cst_32 [1] : vector<8x32xf32> to vector<8xf32>
    %65 = vector.shape_cast %64 : vector<8xf32> to vector<8x1xf32>
    %cst_33 = arith.constant 3.200000e+01 : f32
    %66 = vector.broadcast %cst_33 : f32 to vector<8x1xf32>
    %67 = arith.divf %65, %66 : vector<8x1xf32>
    %68 = vector.broadcast %60 : vector<8x1xf32> to vector<8x32xf32>
    %69 = arith.subf %56, %68 : vector<8x32xf32>
    %cst_34 = arith.constant 9.99999974E-6 : f32
    %70 = vector.broadcast %cst_34 : f32 to vector<8x1xf32>
    %71 = arith.addf %67, %70 : vector<8x1xf32>
    %72 = math.rsqrt %71 : vector<8x1xf32>
    %73 = vector.broadcast %72 : vector<8x1xf32> to vector<8x32xf32>
    %74 = arith.mulf %69, %73 : vector<8x32xf32>
    %c0_35 = arith.constant 0 : index
    %c0_36 = arith.constant 0 : index
    %75 = vector.load %arg8[%c0_35, %c0_36] : memref<32x64xf32, #tpu.memory_space<vmem>>, vector<32x64xf32>
    %cst_37 = arith.constant dense<0.000000e+00> : vector<8x64xf32>
    %76 = tpu.matmul %74, %75, %cst_37 {dimension_numbers = #tpu.dot_dimension_numbers<[1], [0], [0], [1], [0, 0, 1, 1], [], []>} : vector<8x32xf32>, vector<32x64xf32>, vector<8x64xf32> -> vector<8x64xf32>
    %77 = vector.broadcast %18 : vector<1x64xf32> to vector<8x64xf32>
    %78 = arith.addf %76, %77 : vector<8x64xf32>
    %cst_38 = arith.constant 0.000000e+00 : f32
    %79 = vector.broadcast %cst_38 : f32 to vector<8x64xf32>
    %80 = arith.cmpf oge, %78, %79 : vector<8x64xf32>
    %cst_39 = arith.constant 2.000000e-01 : f32
    %81 = vector.broadcast %cst_39 : f32 to vector<8x64xf32>
    %82 = arith.mulf %81, %78 : vector<8x64xf32>
    %83 = arith.select %80, %78, %82 : vector<8x64xi1>, vector<8x64xf32>
    %c0_40 = arith.constant 0 : index
    %c0_41 = arith.constant 0 : index
    %84 = vector.load %arg9[%c0_40, %c0_41] : memref<64x128xf32, #tpu.memory_space<vmem>>, vector<64x128xf32>
    %cst_42 = arith.constant dense<0.000000e+00> : vector<8x128xf32>
    %85 = tpu.matmul %83, %84, %cst_42 {dimension_numbers = #tpu.dot_dimension_numbers<[1], [0], [0], [1], [0, 0, 1, 1], [], []>} : vector<8x64xf32>, vector<64x128xf32>, vector<8x128xf32> -> vector<8x128xf32>
    %86 = vector.broadcast %19 : vector<1x128xf32> to vector<8x128xf32>
    %87 = arith.addf %85, %86 : vector<8x128xf32>
    %c0_43 = arith.constant 0 : index
    %c0_44 = arith.constant 0 : index
    %88 = vector.load %arg2[%c0_43, %c0_44] : memref<8x128xf32, #tpu.memory_space<vmem>>, vector<8x128xf32>
    %89 = arith.addf %87, %88 : vector<8x128xf32>
    %cst_45 = arith.constant dense<0xFF800000> : vector<8xf32>
    %90 = vector.multi_reduction <maximumf>, %89, %cst_45 [1] : vector<8x128xf32> to vector<8xf32>
    %91 = vector.shape_cast %90 : vector<8xf32> to vector<8x1xf32>
    %92 = vector.broadcast %91 : vector<8x1xf32> to vector<8x128xf32>
    %93 = arith.subf %89, %92 : vector<8x128xf32>
    %94 = math.exp %93 : vector<8x128xf32>
    %cst_46 = arith.constant dense<0.000000e+00> : vector<8xf32>
    %95 = vector.multi_reduction <add>, %94, %cst_46 [1] : vector<8x128xf32> to vector<8xf32>
    %96 = vector.shape_cast %95 : vector<8xf32> to vector<8x1xf32>
    %97 = math.log %96 : vector<8x1xf32>
    %98 = vector.broadcast %97 : vector<8x1xf32> to vector<8x128xf32>
    %99 = arith.subf %93, %98 : vector<8x128xf32>
    %c0_47 = arith.constant 0 : index
    %c0_48 = arith.constant 0 : index
    %100 = vector.load %arg11[%c0_47, %c0_48] : memref<8x128xf32, #tpu.memory_space<vmem>>, vector<8x128xf32>
    tpu.vector_store %arg11[%c0_47, %c0_48], %99 {strides = array<i32>} : memref<8x128xf32, #tpu.memory_space<vmem>>, vector<8x128xf32>,
    return
  }
  func.func @transform_0(%arg0: i32) -> (i32, i32) {
    %c0_i32 = arith.constant 0 : i32
    %c0_i32_0 = arith.constant 0 : i32
    return %arg0, %c0_i32 : i32, i32
  }
  func.func @transform_1(%arg0: i32) -> (i32, i32) {
    %c0_i32 = arith.constant 0 : i32
    %c0_i32_0 = arith.constant 0 : i32
    return %arg0, %c0_i32 : i32, i32
  }
  func.func @transform_2(%arg0: i32) -> (i32, i32) {
    %c0_i32 = arith.constant 0 : i32
    %c0_i32_0 = arith.constant 0 : i32
    %c0_i32_1 = arith.constant 0 : i32
    return %c0_i32, %c0_i32_0 : i32, i32
  }
  func.func @transform_3(%arg0: i32) -> (i32, i32) {
    %c0_i32 = arith.constant 0 : i32
    %c0_i32_0 = arith.constant 0 : i32
    %c0_i32_1 = arith.constant 0 : i32
    return %c0_i32, %c0_i32_0 : i32, i32
  }
  func.func @transform_4(%arg0: i32) -> (i32, i32) {
    %c0_i32 = arith.constant 0 : i32
    %c0_i32_0 = arith.constant 0 : i32
    %c0_i32_1 = arith.constant 0 : i32
    return %c0_i32, %c0_i32_0 : i32, i32
  }
  func.func @transform_5(%arg0: i32) -> (i32, i32) {
    %c0_i32 = arith.constant 0 : i32
    %c0_i32_0 = arith.constant 0 : i32
    %c0_i32_1 = arith.constant 0 : i32
    return %c0_i32, %c0_i32_0 : i32, i32
  }
  func.func @transform_6(%arg0: i32) -> (i32, i32) {
    %c0_i32 = arith.constant 0 : i32
    %c0_i32_0 = arith.constant 0 : i32
    %c0_i32_1 = arith.constant 0 : i32
    return %c0_i32, %c0_i32_0 : i32, i32
  }
  func.func @transform_7(%arg0: i32) -> (i32, i32) {
    %c0_i32 = arith.constant 0 : i32
    %c0_i32_0 = arith.constant 0 : i32
    %c0_i32_1 = arith.constant 0 : i32
    return %c0_i32, %c0_i32_0 : i32, i32
  }
  func.func @transform_8(%arg0: i32) -> (i32, i32) {
    %c0_i32 = arith.constant 0 : i32
    %c0_i32_0 = arith.constant 0 : i32
    %c0_i32_1 = arith.constant 0 : i32
    return %c0_i32, %c0_i32_0 : i32, i32
  }
  func.func @transform_9(%arg0: i32) -> (i32, i32) {
    %c0_i32 = arith.constant 0 : i32
    %c0_i32_0 = arith.constant 0 : i32
    %c0_i32_1 = arith.constant 0 : i32
    return %c0_i32, %c0_i32_0 : i32, i32
  }
  func.func @transform_10(%arg0: i32) -> (i32, i32) {
    %c0_i32 = arith.constant 0 : i32
    %c0_i32_0 = arith.constant 0 : i32
    return %arg0, %c0_i32 : i32, i32
  }
}

</mosaic_0001>

<bundles_post_ra>
// kernel: tpu_custom_call.1
= control target key start
LH: loop header
LB: loop body
LE: loop exit
PB: predicated region body
PF: predicated region fallthrough
CT: control target
= control target key end

     0   :  { %15 = vsyncpa [#allocation3], 0  ;;  %s856_s0 = inlined_call_operand.hbm [shape: f32[8,32], index: 0, kind: input, shape index: {}]   ;;  %s857_s1 = inlined_call_operand.hbm [shape: f32[8,128], index: 1, kind: input, shape index: {}]   ;;  %s858_s2 = inlined_call_operand.vmem [shape: f32[32,128], index: 2, kind: input, shape index: {}]   ;;  %s859_s3 = inlined_call_operand.vmem [shape: f32[128,32], index: 3, kind: input, shape index: {}]   ;;  %s860_s4 = inlined_call_operand.vmem [shape: f32[128,128], index: 4, kind: input, shape index: {}]   ;;  %s861_s5 = inlined_call_operand.hbm [shape: f32[32,64], index: 5, kind: input, shape index: {}]   ;;  %s862_s6 = inlined_call_operand.vmem [shape: f32[64,32], index: 6, kind: input, shape index: {}]   ;;  %s863_s7 = inlined_call_operand.hbm [shape: f32[32,64], index: 7, kind: input, shape index: {}]   ;;  %s864_s8 = inlined_call_operand.vmem [shape: f32[64,128], index: 8, kind: input, shape index: {}]   ;;  %s865_s9 = inlined_call_operand.vmem [shape: f32[8,128], index: 9, kind: input, shape index: {}]   ;;  %s866_s10 = inlined_call_operand.hbm [shape: f32[8,128], index: 10, kind: output, shape index: {}]  }
   0x1   :  { %16 = vsyncpa [#allocation6], 0 }
   0x2   :  { %17 = vsyncpa [#allocation9], 0  ;;  %s35_s15 = sshll.u32 %s857_s1, 4  ;;  %s36_s15 = int_to_ptr.hbm [resolvable:$true] %s35_s15 }
   0x3   :  { %18 = vsyncpa [#allocation4], 0  ;;  %s585_s16 = smov [#allocation5]   ;;  %s24_s20 = sshll.u32 %s856_s0, 4  ;;  %s25_s20 = int_to_ptr.hbm [resolvable:$true] %s24_s20 }
   0x4   :  { %s37_s17 = sshll.u32 %s585_s16, 4  ;;  %s586_s21 = smov [#allocation2]   ;;  %s38_s17 = int_to_ptr.vmem [resolvable:$true] %s37_s17 }
   0x5   :  { %40 = dma.hbm_to_vmem [thread:$0]  %s36_s15, 128, %s38_s17, [#allocation6]  }
   0x6   :  { %s26_s22 = sshll.u32 %s586_s21, 4  ;;  %s51_s25 = sshll.u32 %s861_s5, 4  ;;  %s27_s22 = int_to_ptr.vmem [resolvable:$true] %s26_s22  ;;  %s52_s25 = int_to_ptr.hbm [resolvable:$true] %s51_s25 }
   0x7   :  { %29 = dma.hbm_to_vmem [thread:$0]  %s25_s20, 128, %s27_s22, [#allocation3]  }
   0x8   :  { %s587_s1 = smov [#allocation7]   ;;  %s66_s29 = sshll.u32 %s863_s7, 4  ;;  %s67_s29 = int_to_ptr.hbm [resolvable:$true] %s66_s29 }
   0x9   :  { %s53_s26 = sshll.u32 %s587_s1, 4  ;;  %s588_s30 = smov 128   ;;  %s54_s26 = int_to_ptr.vmem [resolvable:$true] %s53_s26 }
   0xa   :  { %s589_s0 = smov 8   ;;  %s590_s11 = smov [#allocation8]  }
   0xb   :  { %59 = dma.hbm_to_vmem [thread:$0]  %s52_s25, 512, %s54_s26, [#allocation6], %s588_s30, %s588_s30, %s589_s0  }
   0xc   :  { %s68_s12 = sshll.u32 %s590_s11, 4  ;;  %s69_s12 = int_to_ptr.vmem [resolvable:$true] %s68_s12 }
   0xd   :  { %74 = dma.hbm_to_vmem [thread:$0]  %s67_s29, 512, %s69_s12, [#allocation9], %s588_s30, %s588_s30, %s589_s0  }
   0xe   :  { %577 = dma.done.wait [#allocation3], 128  }
   0xf   :  { %578 = vsyncadd [#allocation3], 4294967168 }
  0x10   :  { %579 = dma.done.wait [#allocation6], 640  }
  0x11   :  { %580 = vsyncadd [#allocation6], 4294966656 }
  0x12   :  { %581 = dma.done.wait [#allocation9], 512  }
  0x13   :  { %582 = vsyncadd [#allocation9], 4294966784  ;;  %v99_v0 = vld [vmem:[%s858_s2 + $0x18] sm:$0xff]  ;;  %v98_v1 = vld [vmem:[%s858_s2 + $0x10] sm:$0xff]  ;;  %vm100_vm0 = vcmask 261120   ;;  %v591_v48 = vmov 32.0  }
  0x14   :  { %116 = vmatpush.msra.mxu0 %v99_v0  ;;  %v97_v2 = vld [vmem:[%s858_s2 + $0x8] sm:$0xff]  ;;  %v96_v3 = vld [vmem:[%s858_s2] sm:$0xff]  ;;  %v144_v5 = vld [vmem:[%s860_s4 + $0x78] sm:$0xff]  ;;  %vm282_vm6 = vcmask 523264  }
  0x15   :  { %v672_v4 = vld [vmem:[#allocation2] sm:$0xff]  ;;  %v143_v6 = vld [vmem:[%s860_s4 + $0x70] sm:$0xff]  ;;  %145 = vmatpush.msra.mxu1 %v144_v5  ;;  %v142_v7 = vld [vmem:[%s860_s4 + $0x68] sm:$0xff] }
  0x16   :  { %117 = vmatpush.msra.mxu0 %v98_v1  ;;  %v141_v8 = vld [vmem:[%s860_s4 + $0x60] sm:$0xff]  ;;  %v140_v9 = vld [vmem:[%s860_s4 + $0x58] sm:$0xff]  ;;  %v139_v10 = vld [vmem:[%s860_s4 + $0x50] sm:$0xff] }
  0x17   :  { %146 = vmatpush.msra.mxu1 %v143_v6  ;;  %v138_v11 = vld [vmem:[%s860_s4 + $0x48] sm:$0xff]  ;;  %v137_v12 = vld [vmem:[%s860_s4 + $0x40] sm:$0xff]  ;;  %v136_v13 = vld [vmem:[%s860_s4 + $0x38] sm:$0xff] }
  0x18   :  { %118 = vmatpush.msra.mxu0 %v97_v2  ;;  %v135_v14 = vld [vmem:[%s860_s4 + $0x30] sm:$0xff]  ;;  %v134_v16 = vld [vmem:[%s860_s4 + $0x28] sm:$0xff]  ;;  %v133_v17 = vld [vmem:[%s860_s4 + $0x20] sm:$0xff] }
  0x19   :  { %147 = vmatpush.msra.mxu1 %v142_v7  ;;  %v132_v18 = vld [vmem:[%s860_s4 + $0x18] sm:$0xff]  ;;  %v131_v19 = vld [vmem:[%s860_s4 + $0x10] sm:$0xff]  ;;  %v130_v20 = vld [vmem:[%s860_s4 + $0x8] sm:$0xff] }
  0x1a   :  { %119 = vmatpush.msra.mxu0 %v96_v3  ;;  %v129_v21 = vld [vmem:[%s860_s4] sm:$0xff]  ;;  %v182_v22 = vld [vmem:[%s859_s3 + $0x78] sm:$0xff]  ;;  %v181_v23 = vld [vmem:[%s859_s3 + $0x70] sm:$0xff] }
  0x1b   :  { %424 = vmatmul.msk.f32.vlgmr.msra.gmra.mxu0 %vm100_vm0, %v672_v4  ;;  %148 = vmatpush.msra.mxu1 %v141_v8  ;;  %v180_v24 = vld [vmem:[%s859_s3 + $0x68] sm:$0xff]  ;;  %v179_v25 = vld [vmem:[%s859_s3 + $0x60] sm:$0xff]  ;;  %v178_v26 = vld [vmem:[%s859_s3 + $0x58] sm:$0xff] }
  0x1c   :  { %189 = vmatpush.msra.mxu2 %v182_v22  ;;  %v177_v27 = vld [vmem:[%s859_s3 + $0x50] sm:$0xff]  ;;  %v176_v28 = vld [vmem:[%s859_s3 + $0x48] sm:$0xff]  ;;  %v175_v29 = vld [vmem:[%s859_s3 + $0x40] sm:$0xff] }
  0x1d   :  { %149 = vmatpush.msra.mxu1 %v140_v9  ;;  %v174_v30 = vld [vmem:[%s859_s3 + $0x38] sm:$0xff]  ;;  %v173_v31 = vld [vmem:[%s859_s3 + $0x30] sm:$0xff]  ;;  %v172_v32 = vld [vmem:[%s859_s3 + $0x28] sm:$0xff] }
  0x1e   :  { %190 = vmatpush.msra.mxu2 %v181_v23  ;;  %v171_v37 = vld [vmem:[%s859_s3 + $0x20] sm:$0xff]  ;;  %v170_v38 = vld [vmem:[%s859_s3 + $0x18] sm:$0xff]  ;;  %v169_v39 = vld [vmem:[%s859_s3 + $0x10] sm:$0xff] }
  0x1f   :  { %150 = vmatpush.msra.mxu1 %v139_v10  ;;  %v168_v40 = vld [vmem:[%s859_s3 + $0x8] sm:$0xff]  ;;  %v167_v41 = vld [vmem:[%s859_s3] sm:$0xff]  ;;  %v243_v62 = vld [vmem:[#allocation7 + $0x8] sm:$0xff] }
  0x20   :  { %191 = vmatpush.msra.mxu2 %v180_v24  ;;  %v245_v60 = vld [vmem:[#allocation7 + $0x18] sm:$0xff]  ;;  %v244_v61 = vld [vmem:[#allocation7 + $0x10] sm:$0xff]  ;;  %v242_v63 = vld [vmem:[#allocation7] sm:$0xff] }
  0x21   :  { %151 = vmatpush.msra.mxu1 %v138_v11  ;;  %262 = vmatpush.msra.mxu3 %v245_v60  ;;  %v280_v0 = vld [vmem:[%s862_s6 + $0x38] sm:$0xff]  ;;  %v279_v1 = vld [vmem:[%s862_s6 + $0x30] sm:$0xff]  ;;  %v278_v2 = vld [vmem:[%s862_s6 + $0x28] sm:$0xff] }
  0x22   :  { %192 = vmatpush.msra.mxu2 %v179_v25  ;;  %294 = vmatpush.msrb.mxu0 %v280_v0  ;;  %v277_v5 = vld [vmem:[%s862_s6 + $0x20] sm:$0xff]  ;;  %v276_v7 = vld [vmem:[%s862_s6 + $0x18] sm:$0xff] }
  0x23   :  { %152 = vmatpush.msra.mxu1 %v137_v12  ;;  %263 = vmatpush.msra.mxu3 %v244_v61  ;;  %v273_v22 = vld [vmem:[%s862_s6] sm:$0xff] }
  0x24   :  { %193 = vmatpush.msra.mxu2 %v178_v26  ;;  %295 = vmatpush.msrb.mxu0 %v279_v1  ;;  %v439_v23 = vld [vmem:[%s865_s9 + $0x2] ss:$0 sm:$0xff]  ;;  %v441_v61 = vld [vmem:[%s865_s9 + $0x4] ss:$0 sm:$0xff] }
  0x25   :  { %153 = vmatpush.msra.mxu1 %v136_v13  ;;  %264 = vmatpush.msra.mxu3 %v243_v62  ;;  %v360_v60 = vld [vmem:[%s864_s8] sm:$0xff] }
  0x26   :  { %194 = vmatpush.msra.mxu2 %v177_v27  ;;  %296 = vmatpush.msrb.mxu0 %v278_v2  ;;  %v442_v2 = vld [vmem:[%s865_s9 + $0x5] ss:$0 sm:$0xff] }
  0x27   :  { %154 = vmatpush.msra.mxu1 %v135_v14  ;;  %265 = vmatpush.msra.mxu3 %v242_v63  ;;  %v437_v14 = vld [vmem:[%s865_s9] ss:$0 sm:$0xff] }
  0x28   :  { %195 = vmatpush.msra.mxu2 %v176_v28  ;;  %297 = vmatpush.msrb.mxu0 %v277_v5  ;;  %v440_v28 = vld [vmem:[%s865_s9 + $0x3] ss:$0 sm:$0xff] }
  0x29   :  { %155 = vmatpush.msra.mxu1 %v134_v16 }
  0x2a   :  { %196 = vmatpush.msra.mxu2 %v175_v29  ;;  %298 = vmatpush.msrb.mxu0 %v276_v7 }
  0x2b   :  { %156 = vmatpush.msra.mxu1 %v133_v17  ;;  %v438_v17 = vld [vmem:[%s865_s9 + $0x1] ss:$0 sm:$0xff]  ;;  %s412_s9 = sshll.u32 %s866_s10, 4  ;;  %s413_s9 = int_to_ptr.hbm [resolvable:$true] %s412_s9 }
  0x2c   :  { %197 = vmatpush.msra.mxu2 %v174_v30 }
  0x2d   :  { %157 = vmatpush.msra.mxu1 %v132_v18 }
  0x2e   :  { %198 = vmatpush.msra.mxu2 %v173_v31 }
  0x2f   :  { %158 = vmatpush.msra.mxu1 %v131_v19 }
  0x30   :  { %199 = vmatpush.msra.mxu2 %v172_v32 }
  0x31   :  { %159 = vmatpush.msra.mxu1 %v130_v20  ;;  %v275_v20 = vld [vmem:[%s862_s6 + $0x10] sm:$0xff] }
  0x32   :  { %200 = vmatpush.msra.mxu2 %v171_v37  ;;  %299 = vmatpush.msrb.mxu0 %v275_v20 }
  0x33   :  { %160 = vmatpush.msra.mxu1 %v129_v21  ;;  %v274_v21 = vld [vmem:[%s862_s6 + $0x8] sm:$0xff] }
  0x34   :  { %201 = vmatpush.msra.mxu2 %v170_v38  ;;  %300 = vmatpush.msrb.mxu0 %v274_v21  ;;  %v332_v38 = vld [vmem:[#allocation8 + $0x18] sm:$0xff] }
  0x35   :  { %349 = vmatpush.msrb.mxu3 %v332_v38 }
  0x36   :  { %202 = vmatpush.msra.mxu2 %v169_v39  ;;  %301 = vmatpush.msrb.mxu0 %v273_v22  ;;  %v331_v39 = vld [vmem:[#allocation8 + $0x10] sm:$0xff] }
  0x37   :  { %350 = vmatpush.msrb.mxu3 %v331_v39 }
  0x38   :  { %203 = vmatpush.msra.mxu2 %v168_v40  ;;  %v330_v40 = vld [vmem:[#allocation8 + $0x8] sm:$0xff] }
  0x39   :  { %351 = vmatpush.msrb.mxu3 %v330_v40 }
  0x3a   :  { %204 = vmatpush.msra.mxu2 %v167_v41  ;;  %v329_v41 = vld [vmem:[#allocation8] sm:$0xff] }
  0x3b   :  { %352 = vmatpush.msrb.mxu3 %v329_v41 }
  0x98   :  { %v121_v15 = vpop.f32.mrf.mxu0 }
  0x99   :  { %124 = vmax.xlane.f32.xlu0 %v121_v15 }
 0x10c   :  { %v125_v33 = vpop.xlane.xlu0 %124 }
 0x10d   :  { %v126_v34 = vsub.f32 %v121_v15, %v125_v33 }
 0x10f   :  { %v127_v35 = vmul.f32 1.442695, %v126_v34 }
 0x111   :  { %443 = vpow2.f32 %v127_v35 }
 0x117   :  { %v444_v36 = vpop.eup %443 }
 0x118   :  { %161 = vmatmul.f32.vlgmr.msra.gmra.mxu1 %v444_v36 }
 0x195   :  { %v162_v42 = vpop.f32.mrf.mxu1 }
 0x196   :  { %445 = vrcp.f32 %v162_v42  ;;  %v367_v42 = vld [vmem:[%s864_s8 + $0x38] sm:$0xff] }
 0x197   :  { %447 = vrcp.f32 %v591_v48 }
 0x19c   :  { %v446_v43 = vpop.eup %445 }
 0x19d   :  { %v166_v44 = vmul.f32 %v446_v43, %v444_v36  ;;  %v448_v49 = vpop.eup %447  ;;  %v366_v43 = vld [vmem:[%s864_s8 + $0x30] sm:$0xff] }
 0x19e   :  { %v213_v50 = vmul.f32 32.0, %v448_v49  ;;  %vm217_vm1 = vweird.f32 %v448_v49 }
 0x19f   :  { %205 = vmatmul.f32.vlgmr.msra.gmra.mxu2 %v166_v44  ;;  %v365_v44 = vld [vmem:[%s864_s8 + $0x28] sm:$0xff] }
 0x1a0   :  { %v214_v51 = vsub.f32 1.0, %v213_v50 }
 0x1a2   :  { %v215_v52 = vmul.f32 %v448_v49, %v214_v51 }
 0x1a4   :  { %v216_v53 = vadd.f32 %v448_v49, %v215_v52 }
 0x1a6   :  { %v774_v54 = vsel %vm217_vm1, %v448_v49, %v216_v53 }
 0x222   :  { %v206_v45 = vpop.f32.mrf.mxu2 }
 0x223   :  { %v207_v46 = vadd.f32 %v206_v45, %v672_v4  ;;  %v364_v45 = vld [vmem:[%s864_s8 + $0x20] sm:$0xff] }
 0x225   :  { %v209_v47 = vsel %vm100_vm0, %v207_v46, 0.0 }
 0x226   :  { %210 = vadd.xlane.f32.xlu0 %v209_v47 }
 0x299   :  { %v211_v55 = vpop.xlane.xlu0 %210 }
 0x29a   :  { %v219_v56 = vmul.f32 %v774_v54, %v211_v55 }
 0x29c   :  { %v220_v57 = vsub.f32 %v207_v46, %v219_v56  ;;  %v363_v46 = vld [vmem:[%s864_s8 + $0x18] sm:$0xff] }
 0x29e   :  { %v221_v58 = vmul.f32 %v220_v57, %v220_v57 }
 0x2a0   :  { %v222_v59 = vsel %vm100_vm0, %v221_v58, 0.0 }
 0x2a1   :  { %223 = vadd.xlane.f32.xlu1 %v222_v59  ;;  %v361_v59 = vld [vmem:[%s864_s8 + $0x8] sm:$0xff] }
 0x314   :  { %v224_v3 = vpop.xlane.xlu1 %223 }
 0x315   :  { %v225_v4 = vmul.f32 %v224_v3, %v774_v54 }
 0x317   :  { %v226_v6 = vadd.f32 1e-05, %v225_v4  ;;  %v392_v4 = vld [vmem:[#allocation5] sm:$0xff] }
 0x319   :  { %449 = vrsqrt.f32 %v226_v6  ;;  %vm233_vm3 = vweird.f32 %v226_v6 }
 0x31f   :  { %v450_v8 = vpop.eup %449 }
 0x320   :  { %v228_v9 = vmul.f32 %v450_v8, %v226_v6  ;;  %vm234_vm2 = vweird.f32 %v450_v8 }
 0x321   :  { %vm235_vm4 = vmor %vm233_vm3, %vm234_vm2 }
 0x322   :  { %v229_v10 = vmul.f32 %v450_v8, %v228_v9 }
 0x324   :  { %v230_v11 = vmul.f32 0.5, %v229_v10 }
 0x326   :  { %v231_v12 = vsub.f32 1.5, %v230_v11 }
 0x328   :  { %v232_v13 = vmul.f32 %v450_v8, %v231_v12 }
 0x32a   :  { %v236_v15 = vsel %vm235_vm4, %v450_v8, %v232_v13 }
 0x32b   :  { %v237_v16 = vmul.f32 %v236_v15, %v220_v57 }
 0x32d   :  { %v239_v18 = vmul.f32 %v437_v14, %v237_v16 }
 0x32f   :  { %v241_v19 = vadd.f32 %v438_v17, %v239_v18 }
 0x331   :  { %425 = vmatmul.msk.f32.vlgmr.msra.gmra.mxu3 %vm100_vm0, %v241_v19 }
 0x332   :  { %380 = vmatpush.msra.mxu3 %v367_v42 }
 0x334   :  { %381 = vmatpush.msra.mxu3 %v366_v43 }
 0x336   :  { %382 = vmatpush.msra.mxu3 %v365_v44 }
 0x338   :  { %383 = vmatpush.msra.mxu3 %v364_v45 }
 0x33a   :  { %384 = vmatpush.msra.mxu3 %v363_v46 }
 0x3b4   :  { %v267_v24 = vpop.f32.mrf.mxu3 }
 0x3b5   :  { %v268_v25 = vadd.f32 %v439_v23, %v267_v24 }
 0x3b7   :  { %vm270_vm5 = vcmp.ge.f32.partialorder %v268_v25, 0.0  ;;  %v271_v26 = vmul.f32 0.2, %v268_v25 }
 0x3b9   :  { %v272_v27 = vsel %vm270_vm5, %v268_v25, %v271_v26 }
 0x3ba   :  { %426 = vmatmul.msk.f32.vlgmr.msrb.gmra.mxu0 %vm282_vm6, %v272_v27 }
 0x437   :  { %v303_v29 = vpop.f32.mrf.mxu0 }
 0x438   :  { %v304_v30 = vadd.f32 %v440_v28, %v303_v29 }
 0x43a   :  { %v306_v31 = vadd.f32 %v304_v30, %v241_v19 }
 0x43c   :  { %v307_v32 = vsel %vm100_vm0, %v306_v31, 0.0 }
 0x43d   :  { %308 = vadd.xlane.f32.xlu1 %v307_v32 }
 0x4b0   :  { %v309_v33 = vpop.xlane.xlu1 %308 }
 0x4b1   :  { %v310_v34 = vmul.f32 %v309_v33, %v774_v54 }
 0x4b3   :  { %v311_v35 = vsub.f32 %v306_v31, %v310_v34 }
 0x4b5   :  { %v312_v36 = vmul.f32 %v311_v35, %v311_v35 }
 0x4b7   :  { %v313_v37 = vsel %vm100_vm0, %v312_v36, 0.0 }
 0x4b8   :  { %314 = vadd.xlane.f32.xlu2 %v313_v37 }
 0x52b   :  { %v315_v47 = vpop.xlane.xlu2 %314 }
 0x52c   :  { %v316_v48 = vmul.f32 %v315_v47, %v774_v54  ;;  %v362_v54 = vld [vmem:[%s864_s8 + $0x10] sm:$0xff]  ;;  %s592_s8 = smov [#allocation10]  }
 0x52d   :  { %385 = vmatpush.msra.mxu3 %v362_v54  ;;  %s410_s21 = sshll.u32 %s592_s8, 4  ;;  %s411_s21 = int_to_ptr.vmem [resolvable:$true] %s410_s21 }
 0x52e   :  { %v317_v49 = vadd.f32 1e-05, %v316_v48 }
 0x52f   :  { %386 = vmatpush.msra.mxu3 %v361_v59 }
 0x530   :  { %451 = vrsqrt.f32 %v317_v49  ;;  %vm324_vm8 = vweird.f32 %v317_v49 }
 0x531   :  { %387 = vmatpush.msra.mxu3 %v360_v60 }
 0x536   :  { %v452_v50 = vpop.eup %451 }
 0x537   :  { %v319_v51 = vmul.f32 %v452_v50, %v317_v49  ;;  %vm325_vm7 = vweird.f32 %v452_v50 }
 0x538   :  { %vm326_vm9 = vmor %vm324_vm8, %vm325_vm7 }
 0x539   :  { %v320_v52 = vmul.f32 %v452_v50, %v319_v51 }
 0x53b   :  { %v321_v53 = vmul.f32 0.5, %v320_v52 }
 0x53d   :  { %v322_v55 = vsub.f32 1.5, %v321_v53 }
 0x53f   :  { %v323_v56 = vmul.f32 %v452_v50, %v322_v55 }
 0x541   :  { %v327_v57 = vsel %vm326_vm9, %v452_v50, %v323_v56 }
 0x542   :  { %v328_v58 = vmul.f32 %v327_v57, %v311_v35 }
 0x544   :  { %427 = vmatmul.msk.f32.vlgmr.msrb.gmra.mxu3 %vm100_vm0, %v328_v58 }
 0x5c7   :  { %v354_v62 = vpop.f32.mrf.mxu3 }
 0x5c8   :  { %v355_v63 = vadd.f32 %v441_v61, %v354_v62 }
 0x5ca   :  { %vm357_vm10 = vcmp.ge.f32.partialorder %v355_v63, 0.0  ;;  %v358_v0 = vmul.f32 0.2, %v355_v63 }
 0x5cc   :  { %v359_v1 = vsel %vm357_vm10, %v355_v63, %v358_v0 }
 0x5cd   :  { %428 = vmatmul.msk.f32.vlgmr.msra.gmra.mxu3 %vm282_vm6, %v359_v1 }
 0x650   :  { %v389_v3 = vpop.f32.mrf.mxu3 }
 0x651   :  { %v390_v5 = vadd.f32 %v442_v2, %v389_v3 }
 0x653   :  { %v393_v6 = vadd.f32 %v392_v4, %v390_v5 }
 0x655   :  { %394 = vmax.xlane.f32.xlu2 %v393_v6 }
 0x6c8   :  { %v395_v7 = vpop.xlane.xlu2 %394 }
 0x6c9   :  { %v396_v8 = vsub.f32 %v393_v6, %v395_v7 }
 0x6cb   :  { %v397_v9 = vmul.f32 1.442695, %v396_v8 }
 0x6cd   :  { %453 = vpow2.f32 %v397_v9 }
 0x6d3   :  { %v454_v10 = vpop.eup %453 }
 0x6d4   :  { %399 = vadd.xlane.f32.xlu0 %v454_v10 }
 0x747   :  { %v400_v11 = vpop.xlane.xlu0 %399 }
 0x748   :  { %455 = vlog2.f32 %v400_v11 }
 0x74e   :  { %v456_v12 = vpop.eup %455 }
 0x74f   :  { %v402_v13 = vmul.f32 0.6931472, %v456_v12 }
 0x751   :  { %v403_v14 = vsub.f32 %v396_v8, %v402_v13 }
 0x753   :  { %404 = vst [vmem:[#allocation10] sm:$0xff] %v403_v14 }
 0x754   :  { %415 = dma.vmem_to_hbm [thread:$0]  %s411_s21, 128, %s413_s9, [#allocation4]  }
 0x755   :  { %583 = dma.done.wait [#allocation4], 128  }
 0x756   :  { %584 = vsyncadd [#allocation4], 4294967168 }
 0x757   :  { %420 = vsyncpa [#allocation3], 1 }
 0x758   :  { %421 = vsyncpa [#allocation6], 1 }
 0x759   :  { %422 = vsyncpa [#allocation9], 1 }
 0x75a   :  { %423 = vsyncpa [#allocation4], 1 }

</bundles_post_ra>
